<compile_context>
chip_gen: v6e
topology: v6e:2x2x1
jax: 0.10.0
libtpu: 0.0.40
codegen_flags: <defaults>
</compile_context>

<pallas_src>
import jax
import jax.numpy as jnp
from jax.experimental import pallas as pl
from jax.experimental.pallas import tpu as pltpu


def weave_gather_kernel(x_ref, w_ref, b_ref, batch_ref, out_ref,
                        sums_ref, counts_ref):
    i = pl.program_id(1)  # tile index along N (reduction axis)

    @pl.when(i == 0)
    def _init():
        sums_ref[...] = jnp.zeros_like(sums_ref)
        counts_ref[...] = jnp.zeros_like(counts_ref)

    # Linear without bias: y = x_tile @ W_tile  (f32 accumulation on the MXU).
    y = jnp.dot(x_ref[...], w_ref[...], preferred_element_type=jnp.float32)

    # Segment one-hot for this tile: (G_pad, TILE_N).  Padded rows have
    # batch id -1 and never match, so they contribute nothing.
    seg = batch_ref[...]                                    # (1, TILE_N) int32
    g = sums_ref.shape[0]
    tn = seg.shape[1]
    gid = jax.lax.broadcasted_iota(jnp.int32, (g, tn), 0)
    one_hot = (gid == seg).astype(jnp.float32)              # (G_pad, TILE_N)

    # Segment-sum as a matmul (stays on the MXU) + exact f32 counts.
    sums_ref[...] += jnp.dot(one_hot, y.astype(jnp.float32),
                             preferred_element_type=jnp.float32)
    counts_ref[...] += jnp.sum(one_hot, axis=1, keepdims=True)

    @pl.when(i == pl.num_programs(1) - 1)
    def _finalize():
        counts = counts_ref[...]                            # (G_pad, 1)
        inv = pl.reciprocal(jnp.maximum(counts, 1.0), approx=True)
        nonempty = (counts > 0.0).astype(jnp.float32)
        # Bias applied once per graph (hoisted out of the N domain) and masked
        # so empty graphs stay 0, matching torch_scatter's scatter_mean.
        out_ref[...] = sums_ref[...] * inv + b_ref[...] * nonempty


def _round_up(x, m):
    return (x + m - 1) // m * m


def alternate_weave_gather(x, batch, weight, bias, num_graphs, *,
                           tile_n=512, tile_dout=256,
                           compute_dtype=jnp.float32):
    """x: (N, Din), batch: (N,) int ids, weight: (Dout, Din), bias: (Dout,)."""
    N, Din = x.shape
    Dout = weight.shape[0]

    # Lane-dense padding (128 on lane dims, 8 on the graph/sublane dim).
    din_p = _round_up(Din, 128)
    dout_p = _round_up(Dout, 128)
    g_p = _round_up(max(num_graphs, 1), 8)

    # tile_n must be a multiple of 128 so every block satisfies the (8,128)
    # rule (incl. the (1, tile_n) batch block); cap it at the padded N.
    tile_n = max(128, _round_up(min(tile_n, _round_up(N, 128)), 128))
    n_p = _round_up(N, tile_n)

    tile_dout = min(tile_dout, dout_p)
    if dout_p % tile_dout != 0:
        tile_dout = 128  # 128 always divides dout_p

    # Host-side padded operands.
    x_p = jnp.zeros((n_p, din_p), compute_dtype).at[:N, :Din].set(
        x.astype(compute_dtype))
    w_p = jnp.zeros((din_p, dout_p), compute_dtype).at[:Din, :Dout].set(
        weight.T.astype(compute_dtype))
    b_p = jnp.zeros((1, dout_p), jnp.float32).at[0, :Dout].set(
        bias.astype(jnp.float32))
    batch_p = jnp.full((1, n_p), -1, jnp.int32).at[0, :N].set(
        batch.astype(jnp.int32))

    grid = (dout_p // tile_dout, n_p // tile_n)

    out = pl.pallas_call(
        weave_gather_kernel,
        out_shape=jax.ShapeDtypeStruct((g_p, dout_p), jnp.float32),
        grid_spec=pltpu.PrefetchScalarGridSpec(
            num_scalar_prefetch=0,
            grid=grid,
            in_specs=[
                pl.BlockSpec((tile_n, din_p), lambda j, i: (i, 0)),     # x
                pl.BlockSpec((din_p, tile_dout), lambda j, i: (0, j)),  # W^T
                pl.BlockSpec((1, tile_dout), lambda j, i: (0, j)),      # bias
                pl.BlockSpec((1, tile_n), lambda j, i: (0, i)),         # batch
            ],
            out_specs=pl.BlockSpec((g_p, tile_dout), lambda j, i: (0, j)),
            scratch_shapes=[
                pltpu.VMEM((g_p, tile_dout), jnp.float32),  # partial sums
                pltpu.VMEM((g_p, 1), jnp.float32),          # counts
            ],
        ),
        compiler_params=pltpu.CompilerParams(
            dimension_semantics=("parallel", "arbitrary")),
    )(x_p, w_p, b_p, batch_p)

    return out[:num_graphs, :Dout]


if __name__ == "__main__":
    key = jax.random.PRNGKey(0)
    k_x, k_s, k_w, k_b = jax.random.split(key, 4)

    # Small shapes consistent with the forward; N > 128 exercises the
    # multi-tile accumulation path, and graph 3 is intentionally empty.
    N, input_dim, output_dim, num_graphs = 300, 48, 40, 4

    x = jax.random.normal(k_x, (N, input_dim), dtype=jnp.float32)
    batch = jax.random.randint(k_s, (N,), 0, num_graphs - 1).astype(jnp.int32)
    weight = jax.random.normal(k_w, (output_dim, input_dim),
                               dtype=jnp.float32) * 0.1
    bias = jax.random.normal(k_b, (output_dim,), dtype=jnp.float32) * 0.1

    # Pure-JAX reference.
    y_ref = x @ weight.T + bias
    sums = jnp.zeros((num_graphs, output_dim), jnp.float32).at[batch].add(y_ref)
    cnt = jnp.zeros((num_graphs, 1), jnp.float32).at[batch].add(1.0)
    ref = sums / jnp.maximum(cnt, 1.0)

    # f32 path (tile_n=128 -> 3 N-tiles through the accumulator).
    out = alternate_weave_gather(x, batch, weight, bias, num_graphs,
                                 tile_n=128)
    out = jax.block_until_ready(out)
    assert jnp.allclose(out, ref, atol=2e-3, rtol=2e-3), "f32 path mismatch"

    # bf16 matmul-input path (f32 accumulation), looser tolerance.
    out_bf16 = alternate_weave_gather(x, batch, weight, bias, num_graphs,
                                      tile_n=128,
                                      compute_dtype=jnp.bfloat16)
    out_bf16 = jax.block_until_ready(out_bf16)
    assert jnp.allclose(out_bf16, ref, atol=5e-2, rtol=5e-2), \
        "bf16 path mismatch"

    print("KERNEL_OK")
</pallas_src>

<mosaic_0001>
module attributes {stable_mosaic.version = 11 : i64} {
  func.func @weave_gather_kernel(%arg0: i32, %arg1: i32, %arg2: memref<128x128xf32, #tpu.memory_space<vmem>>, %arg3: memref<128x128xf32, #tpu.memory_space<vmem>>, %arg4: memref<1x128xf32, #tpu.memory_space<vmem>>, %arg5: memref<1x128xi32, #tpu.memory_space<vmem>>, %arg6: memref<8x128xf32, #tpu.memory_space<vmem>>, %arg7: memref<8x128xf32, #tpu.memory_space<vmem>>, %arg8: memref<8x1xf32, #tpu.memory_space<vmem>>) attributes {dimension_semantics = [#tpu.dimension_semantics<parallel>, #tpu.dimension_semantics<arbitrary>], iteration_bounds = array<i64: 1, 3>, scalar_prefetch = 0 : i64, scratch_operands = 2 : i64, tpu.core_type = #tpu.core_type<tc>, window_params = [{transform_indices = @transform_0, window_bounds = array<i64: 128, 128>}, {transform_indices = @transform_1, window_bounds = array<i64: 128, 128>}, {transform_indices = @transform_2, window_bounds = array<i64: 1, 128>}, {transform_indices = @transform_3, window_bounds = array<i64: 1, 128>}, {transform_indices = @transform_4, window_bounds = array<i64: 8, 128>}]} {
    %c0_i32 = arith.constant 0 : i32
    %0 = arith.cmpi eq, %arg1, %c0_i32 : i32
    %1 = arith.extui %0 : i1 to i32
    %c0_i32_0 = arith.constant 0 : i32
    %2 = arith.cmpi ne, %1, %c0_i32_0 : i32
    scf.if %2 {
      %cst_17 = arith.constant 0.000000e+00 : f32
      %24 = vector.broadcast %cst_17 : f32 to vector<8x128xf32>
      %c0_18 = arith.constant 0 : index
      %c0_19 = arith.constant 0 : index
      %25 = vector.load %arg7[%c0_18, %c0_19] : memref<8x128xf32, #tpu.memory_space<vmem>>, vector<8x128xf32>
      tpu.vector_store %arg7[%c0_18, %c0_19], %24 {strides = array<i32>} : memref<8x128xf32, #tpu.memory_space<vmem>>, vector<8x128xf32>,
      %cst_20 = arith.constant 0.000000e+00 : f32
      %26 = vector.broadcast %cst_20 : f32 to vector<8x1xf32>
      %c0_21 = arith.constant 0 : index
      %c0_22 = arith.constant 0 : index
      %27 = vector.load %arg8[%c0_21, %c0_22] : memref<8x1xf32, #tpu.memory_space<vmem>>, vector<8x1xf32>
      tpu.vector_store %arg8[%c0_21, %c0_22], %26 {strides = array<i32>} : memref<8x1xf32, #tpu.memory_space<vmem>>, vector<8x1xf32>,
    } else {
    }
    %c0 = arith.constant 0 : index
    %c0_1 = arith.constant 0 : index
    %3 = vector.load %arg2[%c0, %c0_1] : memref<128x128xf32, #tpu.memory_space<vmem>>, vector<128x128xf32>
    %c0_2 = arith.constant 0 : index
    %c0_3 = arith.constant 0 : index
    %4 = vector.load %arg3[%c0_2, %c0_3] : memref<128x128xf32, #tpu.memory_space<vmem>>, vector<128x128xf32>
    %cst = arith.constant dense<0.000000e+00> : vector<128x128xf32>
    %5 = tpu.matmul %3, %4, %cst {dimension_numbers = #tpu.dot_dimension_numbers<[1], [0], [0], [1], [0, 0, 1, 1], [], []>} : vector<128x128xf32>, vector<128x128xf32>, vector<128x128xf32> -> vector<128x128xf32>
    %c0_4 = arith.constant 0 : index
    %c0_5 = arith.constant 0 : index
    %6 = vector.load %arg5[%c0_4, %c0_5] : memref<1x128xi32, #tpu.memory_space<vmem>>, vector<1x128xi32>
    %7 = tpu.iota {dimensions = array<i32: 0>} : vector<8x128xi32>
    %8 = vector.broadcast %6 : vector<1x128xi32> to vector<8x128xi32>
    %9 = arith.cmpi eq, %7, %8 : vector<8x128xi32>
    %10 = arith.extui %9 : vector<8x128xi1> to vector<8x128xi32>
    %11 = arith.sitofp %10 : vector<8x128xi32> to vector<8x128xf32>
    %c0_6 = arith.constant 0 : index
    %c0_7 = arith.constant 0 : index
    %12 = vector.load %arg7[%c0_6, %c0_7] : memref<8x128xf32, #tpu.memory_space<vmem>>, vector<8x128xf32>
    %cst_8 = arith.constant dense<0.000000e+00> : vector<8x128xf32>
    %13 = tpu.matmul %11, %5, %cst_8 {dimension_numbers = #tpu.dot_dimension_numbers<[1], [0], [0], [1], [0, 0, 1, 1], [], []>} : vector<8x128xf32>, vector<128x128xf32>, vector<8x128xf32> -> vector<8x128xf32>
    %14 = arith.addf %12, %13 : vector<8x128xf32>
    %c0_9 = arith.constant 0 : index
    %c0_10 = arith.constant 0 : index
    %15 = vector.load %arg7[%c0_9, %c0_10] : memref<8x128xf32, #tpu.memory_space<vmem>>, vector<8x128xf32>
    tpu.vector_store %arg7[%c0_9, %c0_10], %14 {strides = array<i32>} : memref<8x128xf32, #tpu.memory_space<vmem>>, vector<8x128xf32>,
    %c0_11 = arith.constant 0 : index
    %c0_12 = arith.constant 0 : index
    %16 = vector.load %arg8[%c0_11, %c0_12] : memref<8x1xf32, #tpu.memory_space<vmem>>, vector<8x1xf32>
    %cst_13 = arith.constant dense<0.000000e+00> : vector<8xf32>
    %17 = vector.multi_reduction <add>, %11, %cst_13 [1] : vector<8x128xf32> to vector<8xf32>
    %18 = vector.shape_cast %17 : vector<8xf32> to vector<8x1xf32>
    %19 = arith.addf %16, %18 : vector<8x1xf32>
    %c0_14 = arith.constant 0 : index
    %c0_15 = arith.constant 0 : index
    %20 = vector.load %arg8[%c0_14, %c0_15] : memref<8x1xf32, #tpu.memory_space<vmem>>, vector<8x1xf32>
    tpu.vector_store %arg8[%c0_14, %c0_15], %19 {strides = array<i32>} : memref<8x1xf32, #tpu.memory_space<vmem>>, vector<8x1xf32>,
    %c2_i32 = arith.constant 2 : i32
    %21 = arith.cmpi eq, %arg1, %c2_i32 : i32
    %22 = arith.extui %21 : i1 to i32
    %c0_i32_16 = arith.constant 0 : i32
    %23 = arith.cmpi ne, %22, %c0_i32_16 : i32
    scf.if %23 {
      %c0_17 = arith.constant 0 : index
      %c0_18 = arith.constant 0 : index
      %24 = vector.load %arg8[%c0_17, %c0_18] : memref<8x1xf32, #tpu.memory_space<vmem>>, vector<8x1xf32>
      %cst_19 = arith.constant 1.000000e+00 : f32
      %25 = vector.broadcast %cst_19 : f32 to vector<8x1xf32>
      %26 = arith.maximumf %24, %25 : vector<8x1xf32>
      %27 = tpu.reciprocal %26 {approx = true} : vector<8x1xf32> -> vector<8x1xf32>
      %cst_20 = arith.constant 0.000000e+00 : f32
      %28 = vector.broadcast %cst_20 : f32 to vector<8x1xf32>
      %29 = arith.cmpf ogt, %24, %28 : vector<8x1xf32>
      %30 = arith.extui %29 : vector<8x1xi1> to vector<8x1xi32>
      %31 = arith.sitofp %30 : vector<8x1xi32> to vector<8x1xf32>
      %c0_21 = arith.constant 0 : index
      %c0_22 = arith.constant 0 : index
      %32 = vector.load %arg7[%c0_21, %c0_22] : memref<8x128xf32, #tpu.memory_space<vmem>>, vector<8x128xf32>
      %33 = vector.broadcast %27 : vector<8x1xf32> to vector<8x128xf32>
      %34 = arith.mulf %32, %33 : vector<8x128xf32>
      %c0_23 = arith.constant 0 : index
      %c0_24 = arith.constant 0 : index
      %35 = vector.load %arg4[%c0_23, %c0_24] : memref<1x128xf32, #tpu.memory_space<vmem>>, vector<1x128xf32>
      %36 = vector.broadcast %35 : vector<1x128xf32> to vector<8x128xf32>
      %37 = vector.broadcast %31 : vector<8x1xf32> to vector<8x128xf32>
      %38 = arith.mulf %36, %37 : vector<8x128xf32>
      %39 = arith.addf %34, %38 : vector<8x128xf32>
      %c0_25 = arith.constant 0 : index
      %c0_26 = arith.constant 0 : index
      %40 = vector.load %arg6[%c0_25, %c0_26] : memref<8x128xf32, #tpu.memory_space<vmem>>, vector<8x128xf32>
      tpu.vector_store %arg6[%c0_25, %c0_26], %39 {strides = array<i32>} : memref<8x128xf32, #tpu.memory_space<vmem>>, vector<8x128xf32>,
    } else {
    }
    return
  }
  func.func @transform_0(%arg0: i32, %arg1: i32) -> (i32, i32) {
    %c0_i32 = arith.constant 0 : i32
    %c0_i32_0 = arith.constant 0 : i32
    return %arg1, %c0_i32 : i32, i32
  }
  func.func @transform_1(%arg0: i32, %arg1: i32) -> (i32, i32) {
    %c0_i32 = arith.constant 0 : i32
    %c0_i32_0 = arith.constant 0 : i32
    return %c0_i32, %arg0 : i32, i32
  }
  func.func @transform_2(%arg0: i32, %arg1: i32) -> (i32, i32) {
    %c0_i32 = arith.constant 0 : i32
    %c0_i32_0 = arith.constant 0 : i32
    return %c0_i32, %arg0 : i32, i32
  }
  func.func @transform_3(%arg0: i32, %arg1: i32) -> (i32, i32) {
    %c0_i32 = arith.constant 0 : i32
    %c0_i32_0 = arith.constant 0 : i32
    return %c0_i32, %arg1 : i32, i32
  }
  func.func @transform_4(%arg0: i32, %arg1: i32) -> (i32, i32) {
    %c0_i32 = arith.constant 0 : i32
    %c0_i32_0 = arith.constant 0 : i32
    return %c0_i32, %arg0 : i32, i32
  }
}

</mosaic_0001>

<bundles_post_ra>
// kernel: tpu_custom_call.1
= control target key start
LH: loop header
LB: loop body
LE: loop exit
PB: predicated region body
PF: predicated region fallthrough
CT: control target
= control target key end

     0   :  { %9 = vsyncpa [#allocation5], 0  ;;  %s1280_s0 = inlined_call_operand.hbm [shape: f32[384,128], index: 0, kind: input, shape index: {}]   ;;  %s1281_s1 = inlined_call_operand.hbm [shape: f32[128,128], index: 1, kind: input, shape index: {}]   ;;  %s1282_s2 = inlined_call_operand.vmem [shape: f32[1,128], index: 2, kind: input, shape index: {}]   ;;  %s1283_s3 = inlined_call_operand.vmem [shape: s32[1,384], index: 3, kind: input, shape index: {}]   ;;  %s1284_s4 = inlined_call_operand.hbm [shape: f32[8,128], index: 4, kind: output, shape index: {}]  }
   0x1   :  { %11 = vsyncpa [#allocation5 + $0x1], 0 }
   0x2   :  { %12 = vsyncpa [#allocation8], 0 }
   0x3   :  { %13 = vsyncpa [#allocation6], 0  ;;  %s1101_s15 = smov 0   ;;  %s1103_s16 = smov 0  }
   0x4   :  { %s1105_s17 = smov 0   ;;  %s1107_s18 = smov 0  }
   0x5   :  { %s1109_s19 = smov 0   ;;  %s1111_s20 = smov 0  }
   0x6 LB: > { %s680_s21 = sadd.s32 4294967295, %s1063_s20   ;;  %p51_p0 = scmp.ne.s32.totalorder %s1047_s16, %s1043_s15  ;;  %s1063_s20 = sphi %s1111_s20, %s19_s20   ;;  %s1059_s19 = sphi %s1109_s19, %s1295_s19   ;;  %s1055_s18 = sphi %s1107_s18, %s1294_s18   ;;  %s1051_s17 = sphi %s1105_s17, %s1293_s17   ;;  %s1047_s16 = sphi %s1103_s16, %s1292_s16   ;;  %s1043_s15 = sphi %s1101_s15, %s1291_s15  }
   0x7   : > { %p1133_p1 = scmp.eq.s32.totalorder %s680_s21, 0  ;;  %p681_p2 = scmp.ge.s32.totalorder %s1063_s20, 1 }
   0x8   : > { %p166_p3 = scmp.lt.s32.totalorder %s1063_s20, 4  ;;  %s1065_s25 = smov [#allocation7]  }
   0x9   : > { %p1141_p4 = por %p1133_p1, %p51_p0  ;;  %s180_s26 = sshll.u32 %s1065_s25, 4  ;;  %s181_s26 = int_to_ptr.vmem [resolvable:$true] %s180_s26 }
   0xa   : > { %p1145_p5 = pnand %p681_p2, %p166_p3  ;;  %s28_s28 = sadd.s32 1, %s1059_s19 }
   0xb   : > { %s938_s29 = scalar_lea.vmem %s181_s26, 2048  ;;  %p946_p12 = scmp.lt.s32.totalorder %s181_s26, %s181_s26 }
   0xc   : > { %p853_p6 = pneg %p1145_p5  ;;  %p939_p9 = scmp.ne.s32.totalorder %s181_s26, %s938_s29 }
   0xd   : > { %p947_p13 = scmp.lt.s32.totalorder %s938_s29, %s938_s29 }
   0xe   : > { %p1153_p7 = pnand %p853_p6, %p1133_p1 }
   0xf   : > { %p948_p0 = por %p947_p13, %p946_p12 }
  0x10   : > { %p929_p8 = pneg %p1153_p7 }
  0x12   : > { %p941_p10 = pnand %p939_p9, %p929_p8 }
  0x14   : > { %p942_p11 = pneg %p941_p10 }
  0x16   : > { %p949_p2 = pnand %p948_p0, %p942_p11 }
  0x18   : > { %952 = shalt.err (!%p949_p2)
}
  0x19   : > { %s1066_s30 = smov 128   ;;  %s1067_s5 = smov 8  }
  0x1a   : > { %856 = dma.hbm_to_vmem [thread:$0]  (!%p1153_p7), %s1281_s1, 2048, %s181_s26, [#allocation8], %s1066_s30, %s1066_s30, %s1067_s5  }
  0x1b   : > { %p29_p3 = scmp.ge.s32.totalorder %s28_s28, 3  ;;  %s38_s8 = sadd.s32 1, %s1051_s17 }
  0x1c   : > { %p45_p6 = scmp.ne.s32.totalorder %s1051_s17, %s1047_s16  ;;  %p46_p8 = scmp.eq.s32.totalorder %s1063_s20, 0 }
  0x1d   : > { %s1297_s28 = smov (%p29_p3, %s28_s28), 0  ;;  %p862_p10 = scmp.lt.s32.totalorder %s1063_s20, 3 }
  0x1e   : > { %p47_p9 = por %p46_p8, %p45_p6  ;;  %s35_s9 = ssub.s32 %s1059_s19, %s1297_s28 }
  0x1f   : > { %s200_s10 = sand.u32 1, %s1051_s17   ;;  %p36_p11 = scmp.eq.s32.totalorder %s35_s9, 0 }
  0x20   : > { %s685_s11 = sshll.u32 %s200_s10, 7  ;;  %s702_s12 = sshll.u32 %s1059_s19, 11 }
  0x21   : > { %s1180_s13 = scalar_select %p36_p11, %s1051_s17, %s38_s8  }
  0x22   : > { %s210_s25 = scalar_lea.hbm %s1280_s0, %s702_s12  ;;  %s204_s26 = scalar_lea.vmem [#allocation4], %s685_s11 }
  0x23   : > { %s211_s27 = sshll.u32 %s204_s26, 4  ;;  %p1185_p7 = pnand %p862_p10, %p47_p9  ;;  %s212_s27 = int_to_ptr.vmem [resolvable:$true] %s211_s27 }
  0x24   : > { %s201_s6 = scalar_lea.sflag [#allocation5], %s200_s10  ;;  %s966_s7 = scalar_lea.vmem %s212_s27, 2048 }
  0x25   : > { %p955_p12 = pneg %p1185_p7  ;;  %p967_p13 = scmp.ne.s32.totalorder %s212_s27, %s966_s7 }
  0x26   : > { %s1068_s8 = smov [#allocation4]  }
  0x27   : > { %p969_p0 = pnand %p967_p13, %p955_p12  ;;  %s971_s9 = sshll.u32 %s1068_s8, 4  ;;  %s972_s9 = int_to_ptr.vmem [resolvable:$false] %s971_s9 }
  0x28   : > { %s973_s14 = scalar_lea.vmem %s972_s9, 4096  ;;  %p974_p3 = scmp.lt.s32.totalorder %s212_s27, %s972_s9 }
  0x29   : > { %p970_p2 = pneg %p969_p0  ;;  %p975_p6 = scmp.lt.s32.totalorder %s973_s14, %s966_s7 }
  0x2b   : > { %p976_p8 = por %p975_p6, %p974_p3 }
  0x2d   : > { %p977_p9 = pnand %p976_p8, %p970_p2 }
  0x2f   : > { %980 = shalt.err (!%p977_p9)
}
  0x30   : > { %860 = dma.hbm_to_vmem [thread:$0]  (!%p1185_p7), %s210_s25, 2048, %s212_s27, %s201_s6, %s1066_s30, %s1066_s30, %s1067_s5  }
  0x31   : > { %229 = sbr.rel (%p1145_p5) target bundleno = 713 (0x2c9), region = 36  ;;  %s231_s10 = sand.u32 (!%p1145_p5), 1, %s1047_s16  }
  0x32   : > { %s689_s11 = sshll.u32 (!%p1145_p5), %s231_s10, 7  ;;  %s232_s12 = scalar_lea.sflag (!%p1145_p5), [#allocation5], %s231_s10 }
  0x33   : > { %s1199_s15 = scalar_lea.vmem (!%p1145_p5), [#allocation4], %s689_s11 }
  0x36   : > { %1030 = dma.done.wait (%p1141_p4), %s232_s12, 2048  }
  0x37   : > { %1032 = vsyncadd (%p1141_p4), %s232_s12, 4294965248 }
  0x38   : > { %1034 = dma.done.wait (%p1133_p1), [#allocation8], 2048  }
  0x39   : > { %1036 = vsyncadd (%p1133_p1), [#allocation8], 4294965248  ;;  %p269_p5 = scmp.lt.s32.totalorder %s1055_s18, 2  ;;  %p691_p10 = scmp.ne.s32.totalorder %s1055_s18, 0 }
  0x3b   : > { %s1211_s24 = scalar_select %p269_p5, %s1055_s18, 2 }
  0x3c   : > { %275 = sbr.rel (%p691_p10) target bundleno = 67 (0x43), region = 48 }
  0x3d   : > { %s271_s25 = scalar_lea.vmem %s1283_s3, %s1211_s24 }
  0x41   : > { %vm277_vm0 = vcmask 7168   ;;  %v1069_v0 = vmov 0.0  }
  0x42   : > { %276 = vst [vmem:[#allocation2] sm:$0xff] %v1069_v0  ;;  %278 = vst.msk [vmem:[#allocation3] sm:$0xff] %vm277_vm0, %v1069_v0 }
  0x43 PF: > { %v310_v1 = vld [vmem:[#allocation7 + $0x78] sm:$0xff]  ;;  %v309_v2 = vld [vmem:[#allocation7 + $0x70] sm:$0xff]  ;;  %v308_v3 = vld [vmem:[#allocation7 + $0x68] sm:$0xff]  ;;  %v1070_v33 = vmov 0.0   ;;  %v457_v34 = vlaneseq  ;;  %vm1071_vm1 = vmmov 0   ;;  %v1072_v54 = vmov 1.0  }
  0x44   : > { %752 = vmatprep.subr.mxu0 %v310_v1  ;;  %v307_v4 = vld [vmem:[#allocation7 + $0x60] sm:$0xff]  ;;  %v306_v6 = vld [vmem:[#allocation7 + $0x58] sm:$0xff]  ;;  %v305_v7 = vld [vmem:[#allocation7 + $0x50] sm:$0xff]  ;;  %808 = vmatprep.subr.mxu1 %v1070_v33  ;;  %vm543_vm3 = vcmask 7168   ;;  %p695_p1 = scmp.ne.s32.totalorder %s1055_s18, 2 }
  0x45   : > { %753 = vmatpush3.msra.mxu0 %v310_v1  ;;  %v279_v5 = vld [vmem:[%s1199_s15] sm:$0xff]  ;;  %v304_v8 = vld [vmem:[#allocation7 + $0x48] sm:$0xff]  ;;  %v302_v10 = vld [vmem:[#allocation7 + $0x38] sm:$0xff]  ;;  %v458_v35 = vshrl.u32 %v457_v34, 7  ;;  %840 = vmatprep.mubr.msk.f32.mxu1 %vm1071_vm1, %v1070_v33 }
  0x46   : > { %754 = vmatprep.subr.mxu0 %v309_v2  ;;  %784 = vmatprep.mubr.f32.mxu0 %v279_v5  ;;  %v303_v9 = vld [vmem:[#allocation7 + $0x40] sm:$0xff]  ;;  %v301_v11 = vld [vmem:[#allocation7 + $0x30] sm:$0xff]  ;;  %v300_v12 = vld [vmem:[#allocation7 + $0x28] sm:$0xff] }
  0x47   : > { %755 = vmatpush3.msra.mxu0 %v309_v2  ;;  %v299_v13 = vld [vmem:[#allocation7 + $0x20] sm:$0xff]  ;;  %v298_v14 = vld [vmem:[#allocation7 + $0x18] sm:$0xff]  ;;  %v297_v15 = vld [vmem:[#allocation7 + $0x10] sm:$0xff] }
  0x48   : > { %756 = vmatprep.subr.mxu0 %v308_v3  ;;  %v296_v16 = vld [vmem:[#allocation7 + $0x8] sm:$0xff]  ;;  %v295_v17 = vld [vmem:[#allocation7] sm:$0xff]  ;;  %v281_v19 = vld [vmem:[%s1199_s15 + $0x10] sm:$0xff] }
  0x49   : > { %757 = vmatpush3.msra.mxu0 %v308_v3  ;;  %v280_v18 = vld [vmem:[%s1199_s15 + $0x8] sm:$0xff]  ;;  %v282_v20 = vld [vmem:[%s1199_s15 + $0x18] sm:$0xff]  ;;  %v283_v21 = vld [vmem:[%s1199_s15 + $0x20] sm:$0xff] }
  0x4a   : > { %758 = vmatprep.subr.mxu0 %v307_v4  ;;  %v284_v22 = vld [vmem:[%s1199_s15 + $0x28] sm:$0xff]  ;;  %v285_v23 = vld [vmem:[%s1199_s15 + $0x30] sm:$0xff]  ;;  %v286_v24 = vld [vmem:[%s1199_s15 + $0x38] sm:$0xff] }
  0x4b   : > { %759 = vmatpush3.msra.mxu0 %v307_v4  ;;  %v287_v25 = vld [vmem:[%s1199_s15 + $0x40] sm:$0xff]  ;;  %v288_v26 = vld [vmem:[%s1199_s15 + $0x48] sm:$0xff]  ;;  %v289_v27 = vld [vmem:[%s1199_s15 + $0x50] sm:$0xff] }
  0x4c   : > { %760 = vmatprep.subr.mxu0 %v306_v6  ;;  %v290_v28 = vld [vmem:[%s1199_s15 + $0x58] sm:$0xff]  ;;  %v291_v29 = vld [vmem:[%s1199_s15 + $0x60] sm:$0xff]  ;;  %v292_v30 = vld [vmem:[%s1199_s15 + $0x68] sm:$0xff] }
  0x4d   : > { %761 = vmatpush3.msra.mxu0 %v306_v6  ;;  %v293_v31 = vld [vmem:[%s1199_s15 + $0x70] sm:$0xff]  ;;  %v294_v32 = vld [vmem:[%s1199_s15 + $0x78] sm:$0xff] }
  0x4e   : > { %762 = vmatprep.subr.mxu0 %v305_v7  ;;  %v692_v36 = vld [vmem:[%s271_s25] ss:$0 sm:$0xff]  ;;  %v539_v55 = vld [vmem:[#allocation3] sm:$0xff] }
  0x4f   : > { %763 = vmatpush3.msra.mxu0 %v305_v7  ;;  %vm463_vm2 = vcmp.eq.s32.totalorder %v458_v35, %v692_v36  ;;  %v466_v58 = vld [vmem:[#allocation2] sm:$0xff] }
  0x50   : > { %764 = vmatprep.subr.mxu0 %v304_v8  ;;  %v693_v37 = vsel %vm463_vm2, 1.0, %v1070_v33 }
  0x51   : > { %765 = vmatpush3.msra.mxu0 %v304_v8  ;;  %540 = vadd.xlane.f32.xlu0 %v693_v37 }
  0x52   : > { %766 = vmatprep.subr.mxu0 %v303_v9 }
  0x53   : > { %767 = vmatpush3.msra.mxu0 %v303_v9 }
  0x54   : > { %768 = vmatprep.subr.mxu0 %v302_v10 }
  0x55   : > { %769 = vmatpush3.msra.mxu0 %v302_v10 }
  0x56   : > { %770 = vmatprep.subr.mxu0 %v301_v11 }
  0x57   : > { %771 = vmatpush3.msra.mxu0 %v301_v11 }
  0x58   : > { %772 = vmatprep.subr.mxu0 %v300_v12 }
  0x59   : > { %773 = vmatpush3.msra.mxu0 %v300_v12 }
  0x5a   : > { %774 = vmatprep.subr.mxu0 %v299_v13 }
  0x5b   : > { %775 = vmatpush3.msra.mxu0 %v299_v13 }
  0x5c   : > { %776 = vmatprep.subr.mxu0 %v298_v14 }
  0x5d   : > { %777 = vmatpush3.msra.mxu0 %v298_v14 }
  0x5e   : > { %778 = vmatprep.subr.mxu0 %v297_v15 }
  0x5f   : > { %779 = vmatpush3.msra.mxu0 %v297_v15 }
  0x60   : > { %780 = vmatprep.subr.mxu0 %v296_v16 }
  0x61   : > { %781 = vmatpush3.msra.mxu0 %v296_v16 }
  0x62   : > { %782 = vmatprep.subr.mxu0 %v295_v17 }
  0x63   : > { %783 = vmatpush3.msra.mxu0 %v295_v17 }
  0x64   : > { %785 = vmatmul.mubr.f32.vlgmr.msra.gmra.mxu0 %v280_v18 }
  0x65   : > { %787 = vmatprep.mubr.f32.mxu0 %v281_v19 }
  0x68   : > { %788 = vmatmul.mubr.f32.gmra.mxu0 %v282_v20 }
  0x69   : > { %790 = vmatprep.mubr.f32.mxu0 %v283_v21 }
  0x6c   : > { %791 = vmatmul.mubr.f32.gmra.mxu0 %v284_v22 }
  0x6d   : > { %793 = vmatprep.mubr.f32.mxu0 %v285_v23 }
  0x70   : > { %794 = vmatmul.mubr.f32.gmra.mxu0 %v286_v24 }
  0x71   : > { %796 = vmatprep.mubr.f32.mxu0 %v287_v25 }
  0x74   : > { %797 = vmatmul.mubr.f32.gmra.mxu0 %v288_v26 }
  0x75   : > { %799 = vmatprep.mubr.f32.mxu0 %v289_v27 }
  0x78   : > { %800 = vmatmul.mubr.f32.gmra.mxu0 %v290_v28 }
  0x79   : > { %802 = vmatprep.mubr.f32.mxu0 %v291_v29 }
  0x7c   : > { %803 = vmatmul.mubr.f32.gmra.mxu0 %v292_v30 }
  0x7d   : > { %805 = vmatprep.mubr.f32.mxu0 %v293_v31 }
  0x80   : > { %806 = vmatmul.mubr.f32.gmra.mxu0 %v294_v32 }
  0xda   : > { %v541_v56 = vpop.xlane.xlu0 %540 }
  0xdb   : > { %v542_v57 = vadd.f32 %v541_v56, %v539_v55 }
  0xdd   : > { %544 = vst.msk [vmem:[#allocation3] sm:$0xff] %vm543_vm3, %v542_v57 }
 0x124   : > { %v786_v38 = vpop.f32.mrf.mxu0 }
 0x126   : > { %v377_v39 = vpop.f32.mrf.mxu0 }
 0x128   : > { %v789_v40 = vpop.f32.mrf.mxu0 }
 0x12a   : > { %v387_v41 = vpop.f32.mrf.mxu0 }
 0x12c   : > { %v792_v42 = vpop.f32.mrf.mxu0 }
 0x12e   : > { %v397_v43 = vpop.f32.mrf.mxu0 }
 0x130   : > { %v795_v44 = vpop.f32.mrf.mxu0 }
 0x132   : > { %v407_v45 = vpop.f32.mrf.mxu0 }
 0x134   : > { %v798_v46 = vpop.f32.mrf.mxu0 }
 0x136   : > { %v417_v47 = vpop.f32.mrf.mxu0 }
 0x138   : > { %v801_v48 = vpop.f32.mrf.mxu0 }
 0x13a   : > { %v427_v49 = vpop.f32.mrf.mxu0 }
 0x13c   : > { %v804_v50 = vpop.f32.mrf.mxu0 }
 0x13e   : > { %v437_v51 = vpop.f32.mrf.mxu0 }
 0x140   : > { %v807_v52 = vpop.f32.mrf.mxu0 }
 0x141   : > { %809 = vmatpush3.msra.mxu1 %v807_v52 }
 0x142   : > { %v447_v53 = vpop.f32.mrf.mxu0  ;;  %810 = vmatprep.subr.mxu1 %v1070_v33 }
 0x143   : > { %811 = vmatpush3.msra.mxu1 %v447_v53 }
 0x144   : > { %812 = vmatprep.subr.mxu1 %v1070_v33 }
 0x145   : > { %813 = vmatpush3.msra.mxu1 %v804_v50 }
 0x146   : > { %814 = vmatprep.subr.mxu1 %v1070_v33 }
 0x147   : > { %815 = vmatpush3.msra.mxu1 %v437_v51 }
 0x148   : > { %816 = vmatprep.subr.mxu1 %v1070_v33 }
 0x149   : > { %817 = vmatpush3.msra.mxu1 %v801_v48 }
 0x14a   : > { %818 = vmatprep.subr.mxu1 %v1070_v33 }
 0x14b   : > { %819 = vmatpush3.msra.mxu1 %v427_v49 }
 0x14c   : > { %820 = vmatprep.subr.mxu1 %v1070_v33 }
 0x14d   : > { %821 = vmatpush3.msra.mxu1 %v798_v46 }
 0x14e   : > { %822 = vmatprep.subr.mxu1 %v1070_v33 }
 0x14f   : > { %823 = vmatpush3.msra.mxu1 %v417_v47 }
 0x150   : > { %824 = vmatprep.subr.mxu1 %v1070_v33 }
 0x151   : > { %825 = vmatpush3.msra.mxu1 %v795_v44 }
 0x152   : > { %826 = vmatprep.subr.mxu1 %v1070_v33 }
 0x153   : > { %827 = vmatpush3.msra.mxu1 %v407_v45 }
 0x154   : > { %828 = vmatprep.subr.mxu1 %v1070_v33 }
 0x155   : > { %829 = vmatpush3.msra.mxu1 %v792_v42 }
 0x156   : > { %830 = vmatprep.subr.mxu1 %v1070_v33 }
 0x157   : > { %831 = vmatpush3.msra.mxu1 %v397_v43 }
 0x158   : > { %832 = vmatprep.subr.mxu1 %v1070_v33 }
 0x159   : > { %833 = vmatpush3.msra.mxu1 %v789_v40 }
 0x15a   : > { %834 = vmatprep.subr.mxu1 %v1070_v33 }
 0x15b   : > { %835 = vmatpush3.msra.mxu1 %v387_v41 }
 0x15c   : > { %836 = vmatprep.subr.mxu1 %v1070_v33 }
 0x15d   : > { %837 = vmatpush3.msra.mxu1 %v786_v38 }
 0x15e   : > { %838 = vmatprep.subr.mxu1 %v1070_v33 }
 0x15f   : > { %839 = vmatpush3.msra.mxu1 %v377_v39 }
 0x160   : > { %841 = vmatmul.mubr.msk.f32.vlgmr.msra.gmra.mxu1 %vm463_vm2, %v1072_v54 }
 0x21f   : > { %548 = sbr.rel (%p695_p1) target bundleno = 698 (0x2ba), region = 52 }
 0x220   : > { %v533_v59 = vpop.f32.mrf.mxu1 }
 0x221   : > { %v537_v60 = vadd.f32 %v533_v59, %v466_v58 }
 0x222   : > { %v842_v61 = vpop.f32.mrf.mxu1 }
 0x223   : > { %538 = vst [vmem:[#allocation2] sm:$0xff] %v537_v60 }
 0x224   : > { %v549_v62 = vld [vmem:[#allocation3] sm:$0xff]  ;;  %v1073_v63 = vmov 0   ;;  %v1074_v2 = vmov 0.0   ;;  %v697_v6 = vld [vmem:[%s1282_s2] ss:$0 sm:$0xff] }
 0x225   : > { %924 = vset.pattern.permute.xlu0 %v1073_v63  ;;  %v550_v0 = vmax.f32 %v549_v62, 1.0  ;;  %vm552_vm4 = vcmp.gt.f32.partialorder %v549_v62, 0.0 }
 0x226   : > { %v696_v3 = vsel %vm552_vm4, 1.0, %v1074_v2 }
 0x227   : > { %925 = vrcp.f32 %v550_v0 }
 0x22a   : > { %v555_v5 = vld [vmem:[#allocation2] sm:$0xff] }
 0x234   : > { %v926_v1 = vpop.eup %925 }
 0x235   : > { %558 = vperm.xlu0 %924, %v926_v1  }
 0x239   : > { %571 = vperm.xlu0 %924, %v696_v3  }
 0x2b0   : > { %v559_v4 = vpop.permute.xlu0 %558 }
 0x2b1   : > { %v561_v8 = vmul.f32 %v559_v4, %v555_v5 }
 0x2b4   : > { %v572_v7 = vpop.permute.xlu0 %571 }
 0x2b5   : > { %v574_v9 = vmul.f32 %v697_v6, %v572_v7 }
 0x2b7   : > { %v575_v10 = vadd.f32 %v574_v9, %v561_v8 }
 0x2b9   : > { %576 = vst [vmem:[#allocation9] sm:$0xff] %v575_v10 }
 0x2ba PF: > { %p1247_p4 = scmp.eq.s32.totalorder %s680_s21, 2  ;;  %s1075_s29 = smov [#allocation9]  }
 0x2bb   : > { %s586_s6 = sshll.u32 %s1075_s29, 4  ;;  %s587_s6 = int_to_ptr.vmem [resolvable:$true] %s586_s6 }
 0x2bc   : > { %s981_s7 = scalar_lea.vmem %s587_s6, 128  ;;  %p988_p13 = scmp.lt.s32.totalorder %s587_s6, %s587_s6 }
 0x2bd   : > { %p982_p11 = scmp.ne.s32.totalorder %s587_s6, %s981_s7  ;;  %p989_p0 = scmp.lt.s32.totalorder %s981_s7, %s981_s7 }
 0x2bf   : > { %p983_p7 = pnand %p982_p11, %p1247_p4  ;;  %p990_p2 = por %p989_p0, %p988_p13 }
 0x2c1   : > { %p984_p12 = pneg %p983_p7 }
 0x2c3   : > { %p991_p3 = pnand %p990_p2, %p984_p12 }
 0x2c5   : > { %994 = shalt.err (!%p991_p3)
}
 0x2c6   : > { %850 = dma.vmem_to_hbm [thread:$0]  (%p1247_p4), %s587_s6, 128, %s1284_s4, [#allocation6]  }
 0x2c7   : > { %1038 = dma.done.wait (%p1247_p4), [#allocation6], 128  }
 0x2c8   : > { %1040 = vsyncadd (%p1247_p4), [#allocation6], 4294967168 }
 0x2c9 PF: > { %s19_s20 = sadd.s32 1, %s1063_s20   ;;  %s1291_s15 = smov %s1047_s16 }
 0x2ca   : > { %p16_p6 = scmp.ge.s32.totalorder %s19_s20, 5   ;;  %s1292_s16 = smov %s1051_s17 }
 0x2cb   : > { %s1293_s17 = smov %s1180_s13  ;;  %s1294_s18 = smov %s1059_s19 }
 0x2cc   : > { %s1295_s19 = smov %s1297_s28  ;;  %18 = sbr.rel (!%p16_p6) target bundleno = 6 (0x6), region = 93 }
 0x2d1   :  { %599 = vsyncpa [#allocation5], 1 }
 0x2d2   :  { %601 = vsyncpa [#allocation5 + $0x1], 1 }
 0x2d3   :  { %602 = vsyncpa [#allocation8], 1 }
 0x2d4   :  { %603 = vsyncpa [#allocation6], 1 }
 0x2d5   :  { %605 = vsyncpa [#allocation6 + $0x1], 1 }

</bundles_post_ra>
